<compile_context>
chip_gen: v7x
topology: tpu7x:2x2x1
jax: 0.10.0
libtpu: 0.0.40
codegen_flags: <defaults>
</compile_context>

<pallas_src>
import jax
import jax.numpy as jnp
from jax.experimental import pallas as pl
from jax.experimental.pallas import tpu as pltpu

_LANE = 128
_SUBLANE = 8
_TR_MAX = 4096  # rows per tile: (4096, 128) f32 = 2 MiB / input / buffer


def _mse_partial_kernel(x_ref, t_ref, part_ref):
    """Accumulate per-(sublane, lane) partial sums of (x - t)^2 into part_ref.

    Grid is (P, K): axis 0 is parallel (independent row chunks), axis 1 is the
    sequential reduction over the tiles of a chunk.  part_ref's (8, 128) block
    keeps the same block index across K, so it stays VMEM-resident and acts as
    the accumulator.
    """
    k = pl.program_id(1)

    @pl.when(k == 0)
    def _():
        part_ref[...] = jnp.zeros_like(part_ref)

    d = x_ref[...].astype(jnp.float32) - t_ref[...].astype(jnp.float32)
    sq = d * d
    rows = x_ref.shape[0]
    # Collapse the row tile down to one vreg-shaped (8, 128) partial:
    # pure VPU adds (one add per f32 vreg), no cross-lane XLU reduce in the
    # hot loop.  The reshape groups exactly along (8, 128) vreg boundaries,
    # so it is layout-free.
    part_ref[...] += jnp.sum(sq.reshape(rows // _SUBLANE, _SUBLANE, _LANE), axis=0)


def _tiling(n_elements):
    rows = pl.cdiv(n_elements, _LANE)
    rows = pl.cdiv(rows, _SUBLANE) * _SUBLANE        # multiple of 8 (sublane)
    tr = min(_TR_MAX, rows)                          # biggest tile that makes sense
    nblocks = pl.cdiv(rows, tr)
    p = 2 if nblocks >= 2 else 1                     # megacore split (v7x); no-op elsewhere
    nk = pl.cdiv(nblocks, p)
    rows_padded = p * nk * tr
    return rows_padded, tr, p, nk


def _flatten_pad(x, rows_padded):
    flat = x.reshape(-1)
    pad = rows_padded * _LANE - flat.shape[0]
    if pad:
        flat = jnp.pad(flat, (0, pad))
    return flat.reshape(rows_padded, _LANE)


def _mse_partials(x2d, t2d, tr, p, nk):
    _, lanes = x2d.shape
    tile_bytes = tr * lanes * 4
    # 2 inputs x 2 buffers x tile (<= f32-sized) plus headroom for the
    # in-kernel f32 temporaries (casts, diff, square).
    vmem_limit = int(min(32 << 20, max(8 << 20, 12 * tile_bytes)))
    return pl.pallas_call(
        _mse_partial_kernel,
        out_shape=jax.ShapeDtypeStruct((p * _SUBLANE, lanes), jnp.float32),
        grid_spec=pltpu.PrefetchScalarGridSpec(
            num_scalar_prefetch=0,
            grid=(p, nk),
            in_specs=[
                pl.BlockSpec((tr, lanes), lambda pi, ki: (pi * nk + ki, 0)),
                pl.BlockSpec((tr, lanes), lambda pi, ki: (pi * nk + ki, 0)),
            ],
            out_specs=pl.BlockSpec((_SUBLANE, lanes), lambda pi, ki: (pi, 0)),
        ),
        compiler_params=pltpu.CompilerParams(
            dimension_semantics=("parallel", "arbitrary"),
            vmem_limit_bytes=vmem_limit,
        ),
    )(x2d, t2d)


@jax.jit
def _content_mse(x, target):
    n = x.size
    rows_padded, tr, p, nk = _tiling(n)
    x2d = _flatten_pad(x, rows_padded)
    t2d = _flatten_pad(target, rows_padded)
    partials = _mse_partials(x2d, t2d, tr, p, nk)
    # Final tiny cross-lane / cross-chunk reduction + mean in XLA.
    return jnp.sum(partials) / jnp.float32(n)


class ContentLossPallas:
    """Mirror of the PyTorch ContentLoss module."""

    def __init__(self, target):
        self.target = jax.lax.stop_gradient(target)  # target.detach()
        self.loss = 0.0

    def __call__(self, x):
        self.loss = _content_mse(x, self.target)
        return x  # forward returns the input unchanged


if __name__ == "__main__":
    root = jax.random.PRNGKey(0)

    def run_case(idx, shape, dtype):
        kx, kt = jax.random.split(jax.random.fold_in(root, idx))
        x = jax.random.normal(kx, shape, dtype=jnp.float32).astype(dtype)
        t = jax.random.normal(kt, shape, dtype=jnp.float32).astype(dtype)

        module = ContentLossPallas(t)
        out = module(x)
        out = jax.block_until_ready(out)
        loss = jax.block_until_ready(module.loss)

        ref = jnp.mean((x.astype(jnp.float32) - t.astype(jnp.float32)) ** 2)
        assert jnp.allclose(loss, ref, rtol=1e-5, atol=1e-6), (shape, dtype, loss, ref)
        assert out.shape == x.shape and jnp.array_equal(out, x)

    # Primary demo: NCHW, batch=2, channels=4, spatial=16x16 (2048 elements),
    # collapses to a single full block, grid=(1, 1).
    run_case(0, (2, 4, 16, 16), jnp.float32)
    # Padding path: element count not a multiple of 8*128.
    run_case(1, (3, 5, 7, 11), jnp.float32)
    # Multi-tile path: 2M elements -> rows=16384, tr=4096, P=2 parallel
    # chunks, nk=2 reduction steps; bf16 streaming with f32 accumulation.
    run_case(2, (2, 16, 256, 256), jnp.bfloat16)

    print("KERNEL_OK")
</pallas_src>

<mosaic_0001>
module attributes {stable_mosaic.version = 11 : i64} {
  func.func @_mse_partial_kernel(%arg0: i32, %arg1: i32, %arg2: memref<16x128xf32, #tpu.memory_space<vmem>>, %arg3: memref<16x128xf32, #tpu.memory_space<vmem>>, %arg4: memref<8x128xf32, #tpu.memory_space<vmem>>) attributes {dimension_semantics = [#tpu.dimension_semantics<parallel>, #tpu.dimension_semantics<arbitrary>], iteration_bounds = array<i64: 1, 1>, scalar_prefetch = 0 : i64, scratch_operands = 0 : i64, tpu.core_type = #tpu.core_type<tc>, window_params = [{transform_indices = @transform_0, window_bounds = array<i64: 16, 128>}, {transform_indices = @transform_1, window_bounds = array<i64: 16, 128>}, {transform_indices = @transform_2, window_bounds = array<i64: 8, 128>}]} {
    %c0_i32 = arith.constant 0 : i32
    %0 = arith.cmpi eq, %arg1, %c0_i32 : i32
    %1 = arith.extui %0 : i1 to i32
    %c0_i32_0 = arith.constant 0 : i32
    %2 = arith.cmpi ne, %1, %c0_i32_0 : i32
    scf.if %2 {
      %cst_8 = arith.constant 0.000000e+00 : f32
      %12 = vector.broadcast %cst_8 : f32 to vector<8x128xf32>
      %c0_9 = arith.constant 0 : index
      %c0_10 = arith.constant 0 : index
      %13 = vector.load %arg4[%c0_9, %c0_10] : memref<8x128xf32, #tpu.memory_space<vmem>>, vector<8x128xf32>
      tpu.vector_store %arg4[%c0_9, %c0_10], %12 {strides = array<i32>} : memref<8x128xf32, #tpu.memory_space<vmem>>, vector<8x128xf32>,
    } else {
    }
    %c0 = arith.constant 0 : index
    %c0_1 = arith.constant 0 : index
    %3 = vector.load %arg2[%c0, %c0_1] : memref<16x128xf32, #tpu.memory_space<vmem>>, vector<16x128xf32>
    %c0_2 = arith.constant 0 : index
    %c0_3 = arith.constant 0 : index
    %4 = vector.load %arg3[%c0_2, %c0_3] : memref<16x128xf32, #tpu.memory_space<vmem>>, vector<16x128xf32>
    %5 = arith.subf %3, %4 : vector<16x128xf32>
    %6 = arith.mulf %5, %5 : vector<16x128xf32>
    %c0_4 = arith.constant 0 : index
    %c0_5 = arith.constant 0 : index
    %7 = vector.load %arg4[%c0_4, %c0_5] : memref<8x128xf32, #tpu.memory_space<vmem>>, vector<8x128xf32>
    %8 = vector.shape_cast %6 : vector<16x128xf32> to vector<2x8x128xf32>
    %cst = arith.constant dense<0.000000e+00> : vector<8x128xf32>
    %9 = vector.multi_reduction <add>, %8, %cst [0] : vector<2x8x128xf32> to vector<8x128xf32>
    %10 = arith.addf %7, %9 : vector<8x128xf32>
    %c0_6 = arith.constant 0 : index
    %c0_7 = arith.constant 0 : index
    %11 = vector.load %arg4[%c0_6, %c0_7] : memref<8x128xf32, #tpu.memory_space<vmem>>, vector<8x128xf32>
    tpu.vector_store %arg4[%c0_6, %c0_7], %10 {strides = array<i32>} : memref<8x128xf32, #tpu.memory_space<vmem>>, vector<8x128xf32>,
    return
  }
  func.func @transform_0(%arg0: i32, %arg1: i32) -> (i32, i32) {
    %c1_i32 = arith.constant 1 : i32
    %0 = arith.muli %arg0, %c1_i32 : i32
    %1 = arith.addi %0, %arg1 : i32
    %c0_i32 = arith.constant 0 : i32
    %c0_i32_0 = arith.constant 0 : i32
    return %1, %c0_i32 : i32, i32
  }
  func.func @transform_1(%arg0: i32, %arg1: i32) -> (i32, i32) {
    %c1_i32 = arith.constant 1 : i32
    %0 = arith.muli %arg0, %c1_i32 : i32
    %1 = arith.addi %0, %arg1 : i32
    %c0_i32 = arith.constant 0 : i32
    %c0_i32_0 = arith.constant 0 : i32
    return %1, %c0_i32 : i32, i32
  }
  func.func @transform_2(%arg0: i32, %arg1: i32) -> (i32, i32) {
    %c0_i32 = arith.constant 0 : i32
    %c0_i32_0 = arith.constant 0 : i32
    return %arg0, %c0_i32 : i32, i32
  }
}

</mosaic_0001>

<bundles_post_ra>
// kernel: _content_mse.1
= control target key start
LH: loop header
LB: loop body
LE: loop exit
PB: predicated region body
PF: predicated region fallthrough
CT: control target
= control target key end

     0   :  { %s119_s0 = inlined_call_operand.vmem [shape: f32[16,128], index: 0, kind: input, shape index: {}]   ;;  %s120_s1 = inlined_call_operand.vmem [shape: f32[16,128], index: 1, kind: input, shape index: {}]   ;;  %s121_s2 = inlined_call_operand.vmem [shape: f32[8,128], index: 2, kind: output, shape index: {}]  }
   0x1   :  { %v60_v0 = vld [vmem:[%s119_s0] sm:$0xff]  ;;  %v61_v1 = vld [vmem:[%s119_s0 + $0x8] sm:$0xff] }
   0x2   :  { %v62_v2 = vld [vmem:[%s120_s1] sm:$0xff]  ;;  %v63_v3 = vld [vmem:[%s120_s1 + $0x8] sm:$0xff] }
   0x3   :  { %v64_v4 = vsub.f32 %v60_v0, %v62_v2  ;;  %v65_v5 = vsub.f32 %v61_v1, %v63_v3 }
   0x5   :  { %v66_v6 = vmul.f32 %v64_v4, %v64_v4  ;;  %v67_v7 = vmul.f32 %v65_v5, %v65_v5 }
   0x7   :  { %v69_v8 = vadd.f32 %v67_v7, %v66_v6 }
   0x9   :  { %71 = vst [vmem:[%s121_s2] sm:$0xff] %v69_v8 }

</bundles_post_ra>
